<compile_context>
chip_gen: v6e
topology: v6e:2x2x1
jax: 0.10.0
libtpu: 0.0.40
codegen_flags: <defaults>
</compile_context>

<pallas_src>
import functools

import jax
import jax.numpy as jnp
from jax.experimental import pallas as pl
from jax.experimental.pallas import tpu as pltpu


_LANE = 128
# Below this total I/O volume the per-grid-step overhead (~0.35 us) dominates,
# so we collapse everything into a single grid step.
_SMALL_PROBLEM_BYTES = 2 * 1024 * 1024


# ----------------------------------------------------------------------------
# Pallas kernel: pointwise conv in native NCHW layout (spatial dim on lanes)
# ----------------------------------------------------------------------------
def _pointwise_conv_kernel(x_ref, w_ref, b_ref, o_ref, *, nb, c_in, use_mxu):
    # x_ref: (nb, C_in, T)   w_ref: (C_out, C_in)   b_ref: (C_out, 1)
    # o_ref: (nb, C_out, T)  with T the lane-axis spatial tile (multiple of 128).
    w = w_ref[...]                                   # (C_out, C_in)
    b = b_ref[...]                                   # (C_out, 1)
    # Hoist the per-channel weight columns once (not per image / per FMA).
    w_cols = [w[:, c:c + 1] for c in range(c_in)]    # each (C_out, 1)

    for i in range(nb):                              # static unroll over images in the block
        x = x_ref[i]                                 # (C_in, T), lane-dense
        if use_mxu:
            # Large contraction AND large output rows: let the MXU do it.
            acc = jnp.dot(w, x, preferred_element_type=jnp.float32)
        else:
            # Tiny channel counts: unrolled VPU FMAs, (C_out,1) x (1,T) broadcasts.
            # TODO(synk): a stride-0 sublane-broadcast load
            #   (x_ref view + pl.ds(c, c_out, stride=0)) would move the sublane
            #   replication into the underused load slots; minor at these sizes.
            acc = w_cols[0] * x[0:1, :]
            for c in range(1, c_in):
                acc = acc + w_cols[c] * x[c:c + 1, :]
        acc = acc + b                                # (C_out,1) broadcast over lanes
        o_ref[i] = jnp.maximum(acc, 0.0).astype(o_ref.dtype)


# ----------------------------------------------------------------------------
# Generation-aware tiling
# ----------------------------------------------------------------------------
def _vmem_capacity_bytes():
    try:
        return int(pltpu.get_tpu_info().vmem_capacity_bytes)
    except Exception:
        return 64 * 1024 * 1024          # v7x per-TC value (smallest of v5e/v6e/v7x)


def _choose_tiling(n, c_in, c_out, hw_padded, itemsize):
    """Returns (nb images per block, spatial tile, vmem capacity)."""
    vmem_cap = _vmem_capacity_bytes()
    budget = vmem_cap // 2                           # ~half of VMEM, leaves headroom
    # Double-buffered input + output tile bytes per spatial lane column.
    bytes_per_lane = 2 * (c_in + c_out) * itemsize
    max_lanes = max(_LANE, budget // bytes_per_lane)

    total_io_bytes = n * hw_padded * (c_in + c_out) * itemsize
    if total_io_bytes <= _SMALL_PROBLEM_BYTES and n * hw_padded <= max_lanes:
        # Tiny problem: one grid step, whole batch in the block (also packs the
        # half-empty c_in<8 sublanes of several images into the same vregs).
        return n, hw_padded, vmem_cap

    # Realistic sizes: one image per block; biggest lane-dense spatial tile that
    # (a) divides hw_padded (every store stays an unmasked vst) and
    # (b) fits the VMEM budget.
    k = hw_padded // _LANE
    tile_hw = _LANE
    for d in range(k, 0, -1):
        if k % d == 0 and d * _LANE * bytes_per_lane <= budget:
            tile_hw = d * _LANE
            break
    # Keep >= 2 total grid steps so v7x's two TensorCores both get work.
    if n == 1 and tile_hw == hw_padded and k > 1:
        for d in range(k // 2, 0, -1):
            if k % d == 0:
                tile_hw = d * _LANE
                break
    return 1, tile_hw, vmem_cap


def pointwise_conv_relu_nchw(x_ncl, w, b, out_dtype=None):
    """x_ncl: (N, C_in, HW), w: (C_out, C_in), b: (C_out, 1).

    Returns (N, C_out, HW) = relu(w @ x + b) per image, already channel-major.
    """
    n, c_in, hw = x_ncl.shape
    c_out = w.shape[0]
    out_dtype = out_dtype if out_dtype is not None else x_ncl.dtype

    # Pad the spatial axis once to a lane multiple so every tile is lane-dense.
    hw_padded = ((hw + _LANE - 1) // _LANE) * _LANE
    if hw_padded != hw:
        x_ncl = jnp.pad(x_ncl, ((0, 0), (0, 0), (0, hw_padded - hw)))

    itemsize = max(jnp.dtype(x_ncl.dtype).itemsize, jnp.dtype(out_dtype).itemsize)
    nb, tile_hw, vmem_cap = _choose_tiling(n, c_in, c_out, hw_padded, itemsize)
    grid = (n // nb, hw_padded // tile_hw)

    # MXU only pays off when BOTH matmul output dims are MXU-sized; otherwise a
    # handful of VPU FMAs wins (c_out=8 would occupy <=6% of the MXU rows).
    use_mxu = (c_in >= 128) and (c_out >= 128)

    kernel = functools.partial(
        _pointwise_conv_kernel, nb=nb, c_in=c_in, use_mxu=use_mxu)

    tile_bytes = nb * (c_in + c_out) * tile_hw * itemsize
    vmem_limit = int(min(vmem_cap, max(32 * 1024 * 1024, 4 * tile_bytes)))

    y = pl.pallas_call(
        kernel,
        out_shape=jax.ShapeDtypeStruct((n, c_out, hw_padded), out_dtype),
        grid_spec=pltpu.PrefetchScalarGridSpec(
            num_scalar_prefetch=0,
            grid=grid,
            in_specs=[
                # activation tile: nb images, all channels, lane-dense spatial tile
                pl.BlockSpec((nb, c_in, tile_hw), lambda i, t: (i, 0, t)),
                # weights / bias: whole small arrays, constant index -> resident
                pl.BlockSpec((c_out, c_in), lambda i, t: (0, 0)),
                pl.BlockSpec((c_out, 1), lambda i, t: (0, 0)),
            ],
            out_specs=pl.BlockSpec((nb, c_out, tile_hw), lambda i, t: (i, 0, t)),
        ),
        compiler_params=pltpu.CompilerParams(
            dimension_semantics=("parallel", "parallel"),
            vmem_limit_bytes=vmem_limit),
    )(x_ncl, w, b)

    if hw_padded != hw:
        y = y[:, :, :hw]
    return y


# ----------------------------------------------------------------------------
# Synthetic inner module (what `self.model` would be) + BaseModel wrapper
# ----------------------------------------------------------------------------
class SyntheticPointwiseConvModule:
    """Deterministic stand-in for the unspecified `module` passed to BaseModel."""

    def __init__(self, c_in, c_out, key):
        k_w, k_b = jax.random.split(key)
        # weight stored as (C_out, C_in) — matches the kernel's NCHW layout
        self.w = (jax.random.normal(k_w, (c_out, c_in), dtype=jnp.float32)
                  * (1.0 / jnp.sqrt(c_in)))
        self.b = jax.random.normal(k_b, (c_out, 1), dtype=jnp.float32) * 0.01

    def __call__(self, x_nchw):
        n, c, h, w = x_nchw.shape
        # NCHW -> (N, C, H*W): a pure reshape, no transpose / extra HBM traffic.
        x_flat = x_nchw.reshape(n, c, h * w)
        y_flat = pointwise_conv_relu_nchw(x_flat, self.w, self.b)
        c_out = self.w.shape[0]
        # already channel-major: just fold the spatial axis back
        return y_flat.reshape(n, c_out, h, w)


class BaseModel:
    """JAX/Pallas port of hdecoder BaseModel: a transparent wrapper.

    forward(*inputs) delegates to the wrapped module, exactly mirroring the
    PyTorch semantics.
    """

    def __init__(self, opt, module):
        self.opt = opt
        self.model = module
        # TODO(synk): torchvision Resize(800, BICUBIC) preprocessing pipeline
        # (self.tranform_for_inference) is image-file I/O glue with no Pallas
        # equivalent; omitted.

    def forward(self, *inputs, **kwargs):
        return self.model(*inputs, **kwargs)

    __call__ = forward

    # inference(), save_pretrained(), from_pretrained() are file-I/O /
    # checkpoint utilities — not translatable to a kernel.


# ----------------------------------------------------------------------------
# Driver
# ----------------------------------------------------------------------------
if __name__ == "__main__":
    key = jax.random.PRNGKey(0)
    k_x, k_p = jax.random.split(key)

    N, C_IN, H, W = 2, 4, 16, 16   # NCHW, as in PyTorch convention
    C_OUT = 8

    x = jax.random.normal(k_x, (N, C_IN, H, W), dtype=jnp.float32)

    inner = SyntheticPointwiseConvModule(C_IN, C_OUT, k_p)
    model = BaseModel(opt={"device": "tpu"}, module=inner)

    out = model(x)
    out = jax.block_until_ready(out)

    # sanity check against a pure-JAX reference of the same inner module
    ref = jnp.maximum(
        jnp.einsum("oc,nchw->nohw", inner.w, x) + inner.b.reshape(1, C_OUT, 1, 1),
        0.0,
    )
    assert out.shape == (N, C_OUT, H, W)
    assert jnp.allclose(out, ref, atol=1e-5, rtol=1e-5)

    print("KERNEL_OK")
</pallas_src>

<mosaic_0001>
module attributes {stable_mosaic.version = 11 : i64} {
  func.func @_pointwise_conv_kernel(%arg0: i32, %arg1: i32, %arg2: memref<2x4x256xf32, #tpu.memory_space<vmem>>, %arg3: memref<8x4xf32, #tpu.memory_space<vmem>>, %arg4: memref<8x1xf32, #tpu.memory_space<vmem>>, %arg5: memref<2x8x256xf32, #tpu.memory_space<vmem>>) attributes {dimension_semantics = [#tpu.dimension_semantics<parallel>, #tpu.dimension_semantics<parallel>], iteration_bounds = array<i64: 1, 1>, scalar_prefetch = 0 : i64, scratch_operands = 0 : i64, tpu.core_type = #tpu.core_type<tc>, window_params = [{transform_indices = @transform_0, window_bounds = array<i64: 2, 4, 256>}, {pipeline_mode = #tpu.pipeline_mode<synchronous>, transform_indices = @transform_1, window_bounds = array<i64: 8, 4>}, {pipeline_mode = #tpu.pipeline_mode<synchronous>, transform_indices = @transform_2, window_bounds = array<i64: 8, 1>}, {transform_indices = @transform_3, window_bounds = array<i64: 2, 8, 256>}]} {
    %c0 = arith.constant 0 : index
    %c0_0 = arith.constant 0 : index
    %0 = vector.load %arg3[%c0, %c0_0] : memref<8x4xf32, #tpu.memory_space<vmem>>, vector<8x4xf32>
    %c0_1 = arith.constant 0 : index
    %c0_2 = arith.constant 0 : index
    %1 = vector.load %arg4[%c0_1, %c0_2] : memref<8x1xf32, #tpu.memory_space<vmem>>, vector<8x1xf32>
    %2 = vector.extract_strided_slice %0 {offsets = [0, 0], sizes = [8, 1], strides = [1, 1]} : vector<8x4xf32> to vector<8x1xf32>
    %3 = vector.extract_strided_slice %0 {offsets = [0, 1], sizes = [8, 1], strides = [1, 1]} : vector<8x4xf32> to vector<8x1xf32>
    %4 = vector.extract_strided_slice %0 {offsets = [0, 2], sizes = [8, 1], strides = [1, 1]} : vector<8x4xf32> to vector<8x1xf32>
    %5 = vector.extract_strided_slice %0 {offsets = [0, 3], sizes = [8, 1], strides = [1, 1]} : vector<8x4xf32> to vector<8x1xf32>
    %c0_3 = arith.constant 0 : index
    %c0_4 = arith.constant 0 : index
    %c0_5 = arith.constant 0 : index
    %6 = vector.load %arg2[%c0_3, %c0_4, %c0_5] : memref<2x4x256xf32, #tpu.memory_space<vmem>>, vector<1x4x256xf32>
    %7 = vector.shape_cast %6 : vector<1x4x256xf32> to vector<4x256xf32>
    %8 = vector.extract_strided_slice %7 {offsets = [0, 0], sizes = [1, 256], strides = [1, 1]} : vector<4x256xf32> to vector<1x256xf32>
    %9 = vector.broadcast %2 : vector<8x1xf32> to vector<8x256xf32>
    %10 = vector.broadcast %8 : vector<1x256xf32> to vector<8x256xf32>
    %11 = arith.mulf %9, %10 : vector<8x256xf32>
    %12 = vector.extract_strided_slice %7 {offsets = [1, 0], sizes = [1, 256], strides = [1, 1]} : vector<4x256xf32> to vector<1x256xf32>
    %13 = vector.broadcast %3 : vector<8x1xf32> to vector<8x256xf32>
    %14 = vector.broadcast %12 : vector<1x256xf32> to vector<8x256xf32>
    %15 = arith.mulf %13, %14 : vector<8x256xf32>
    %16 = arith.addf %11, %15 : vector<8x256xf32>
    %17 = vector.extract_strided_slice %7 {offsets = [2, 0], sizes = [1, 256], strides = [1, 1]} : vector<4x256xf32> to vector<1x256xf32>
    %18 = vector.broadcast %4 : vector<8x1xf32> to vector<8x256xf32>
    %19 = vector.broadcast %17 : vector<1x256xf32> to vector<8x256xf32>
    %20 = arith.mulf %18, %19 : vector<8x256xf32>
    %21 = arith.addf %16, %20 : vector<8x256xf32>
    %22 = vector.extract_strided_slice %7 {offsets = [3, 0], sizes = [1, 256], strides = [1, 1]} : vector<4x256xf32> to vector<1x256xf32>
    %23 = vector.broadcast %5 : vector<8x1xf32> to vector<8x256xf32>
    %24 = vector.broadcast %22 : vector<1x256xf32> to vector<8x256xf32>
    %25 = arith.mulf %23, %24 : vector<8x256xf32>
    %26 = arith.addf %21, %25 : vector<8x256xf32>
    %27 = vector.broadcast %1 : vector<8x1xf32> to vector<8x256xf32>
    %28 = arith.addf %26, %27 : vector<8x256xf32>
    %cst = arith.constant 0.000000e+00 : f32
    %29 = vector.broadcast %cst : f32 to vector<8x256xf32>
    %30 = arith.maximumf %28, %29 : vector<8x256xf32>
    %c0_6 = arith.constant 0 : index
    %c0_7 = arith.constant 0 : index
    %c0_8 = arith.constant 0 : index
    %31 = vector.load %arg5[%c0_6, %c0_7, %c0_8] : memref<2x8x256xf32, #tpu.memory_space<vmem>>, vector<1x8x256xf32>
    %32 = vector.shape_cast %31 : vector<1x8x256xf32> to vector<8x256xf32>
    %33 = vector.shape_cast %30 : vector<8x256xf32> to vector<1x8x256xf32>
    tpu.vector_store %arg5[%c0_6, %c0_7, %c0_8], %33 {strides = array<i32>} : memref<2x8x256xf32, #tpu.memory_space<vmem>>, vector<1x8x256xf32>,
    %c1 = arith.constant 1 : index
    %c0_9 = arith.constant 0 : index
    %c0_10 = arith.constant 0 : index
    %34 = vector.load %arg2[%c1, %c0_9, %c0_10] : memref<2x4x256xf32, #tpu.memory_space<vmem>>, vector<1x4x256xf32>
    %35 = vector.shape_cast %34 : vector<1x4x256xf32> to vector<4x256xf32>
    %36 = vector.extract_strided_slice %35 {offsets = [0, 0], sizes = [1, 256], strides = [1, 1]} : vector<4x256xf32> to vector<1x256xf32>
    %37 = vector.broadcast %2 : vector<8x1xf32> to vector<8x256xf32>
    %38 = vector.broadcast %36 : vector<1x256xf32> to vector<8x256xf32>
    %39 = arith.mulf %37, %38 : vector<8x256xf32>
    %40 = vector.extract_strided_slice %35 {offsets = [1, 0], sizes = [1, 256], strides = [1, 1]} : vector<4x256xf32> to vector<1x256xf32>
    %41 = vector.broadcast %3 : vector<8x1xf32> to vector<8x256xf32>
    %42 = vector.broadcast %40 : vector<1x256xf32> to vector<8x256xf32>
    %43 = arith.mulf %41, %42 : vector<8x256xf32>
    %44 = arith.addf %39, %43 : vector<8x256xf32>
    %45 = vector.extract_strided_slice %35 {offsets = [2, 0], sizes = [1, 256], strides = [1, 1]} : vector<4x256xf32> to vector<1x256xf32>
    %46 = vector.broadcast %4 : vector<8x1xf32> to vector<8x256xf32>
    %47 = vector.broadcast %45 : vector<1x256xf32> to vector<8x256xf32>
    %48 = arith.mulf %46, %47 : vector<8x256xf32>
    %49 = arith.addf %44, %48 : vector<8x256xf32>
    %50 = vector.extract_strided_slice %35 {offsets = [3, 0], sizes = [1, 256], strides = [1, 1]} : vector<4x256xf32> to vector<1x256xf32>
    %51 = vector.broadcast %5 : vector<8x1xf32> to vector<8x256xf32>
    %52 = vector.broadcast %50 : vector<1x256xf32> to vector<8x256xf32>
    %53 = arith.mulf %51, %52 : vector<8x256xf32>
    %54 = arith.addf %49, %53 : vector<8x256xf32>
    %55 = vector.broadcast %1 : vector<8x1xf32> to vector<8x256xf32>
    %56 = arith.addf %54, %55 : vector<8x256xf32>
    %cst_11 = arith.constant 0.000000e+00 : f32
    %57 = vector.broadcast %cst_11 : f32 to vector<8x256xf32>
    %58 = arith.maximumf %56, %57 : vector<8x256xf32>
    %c1_12 = arith.constant 1 : index
    %c0_13 = arith.constant 0 : index
    %c0_14 = arith.constant 0 : index
    %59 = vector.load %arg5[%c1_12, %c0_13, %c0_14] : memref<2x8x256xf32, #tpu.memory_space<vmem>>, vector<1x8x256xf32>
    %60 = vector.shape_cast %59 : vector<1x8x256xf32> to vector<8x256xf32>
    %61 = vector.shape_cast %58 : vector<8x256xf32> to vector<1x8x256xf32>
    tpu.vector_store %arg5[%c1_12, %c0_13, %c0_14], %61 {strides = array<i32>} : memref<2x8x256xf32, #tpu.memory_space<vmem>>, vector<1x8x256xf32>,
    return
  }
  func.func @transform_0(%arg0: i32, %arg1: i32) -> (i32, i32, i32) {
    %c0_i32 = arith.constant 0 : i32
    %c0_i32_0 = arith.constant 0 : i32
    return %arg0, %c0_i32, %arg1 : i32, i32, i32
  }
  func.func @transform_1(%arg0: i32, %arg1: i32) -> (i32, i32) {
    %c0_i32 = arith.constant 0 : i32
    %c0_i32_0 = arith.constant 0 : i32
    %c0_i32_1 = arith.constant 0 : i32
    return %c0_i32, %c0_i32_0 : i32, i32
  }
  func.func @transform_2(%arg0: i32, %arg1: i32) -> (i32, i32) {
    %c0_i32 = arith.constant 0 : i32
    %c0_i32_0 = arith.constant 0 : i32
    %c0_i32_1 = arith.constant 0 : i32
    return %c0_i32, %c0_i32_0 : i32, i32
  }
  func.func @transform_3(%arg0: i32, %arg1: i32) -> (i32, i32, i32) {
    %c0_i32 = arith.constant 0 : i32
    %c0_i32_0 = arith.constant 0 : i32
    return %arg0, %c0_i32, %arg1 : i32, i32, i32
  }
}

</mosaic_0001>

<bundles_post_ra>
// kernel: tpu_custom_call.1
= control target key start
LH: loop header
LB: loop body
LE: loop exit
PB: predicated region body
PF: predicated region fallthrough
CT: control target
= control target key end

     0   :  { %v281_v1 = vmov 0   ;;  %v282_v2 = vmov 2   ;;  %s323_s0 = inlined_call_operand.vmem [shape: f32[2,4,256], index: 0, kind: input, shape index: {}]   ;;  %s324_s1 = inlined_call_operand.vmem [shape: f32[8,4], index: 1, kind: input, shape index: {}]   ;;  %s325_s2 = inlined_call_operand.vmem [shape: f32[8,1], index: 2, kind: input, shape index: {}]   ;;  %s326_s3 = inlined_call_operand.hbm [shape: f32[2,8,256], index: 3, kind: output, shape index: {}]  }
   0x1   :  { %v15_v0 = vld [vmem:[%s324_s1] sm:$0xff]  ;;  %253 = vset.pattern.permute.xlu0 %v281_v1  ;;  %255 = vset.pattern.permute.xlu1 %v282_v2 }
   0x2   :  { %8 = vsyncpa [#allocation3], 0  ;;  %20 = vperm.xlu0 %253, %v15_v0   ;;  %71 = vperm.xlu1 %255, %v15_v0   ;;  %v283_v3 = vmov 1   ;;  %v284_v4 = vmov 3   ;;  %v16_v5 = vld [vmem:[%s325_s2] sm:$0xff]  ;;  %v24_v6 = vlaneseq  ;;  %v245_v11 = vld [vmem:[%s323_s0 + $0x8] sm:$0xff] }
   0x3   :  { %v17_v10 = vld [vmem:[%s323_s0] sm:$0xff]  ;;  %s285_s0 = smov [#allocation2]  }
   0x4   :  { %v25_v7 = vshrl.u32 %v24_v6, 7  ;;  %s234_s2 = sshll.u32 %s285_s0, 4  ;;  %s235_s2 = int_to_ptr.vmem [resolvable:$true] %s234_s2 }
   0x5   :  { %s259_s19 = scalar_lea.vmem %s235_s2, 512  ;;  %p264_p1 = scmp.lt.s32.totalorder %s235_s2, %s235_s2 }
   0x6   :  { %254 = vset.pattern.permute.xlu0 %v283_v3  ;;  %256 = vset.pattern.permute.xlu1 %v284_v4  ;;  %v26_v8 = vsub.s32 0, %v25_v7  ;;  %v30_v9 = vsub.s32 4, %v25_v7  ;;  %v76_v12 = vsub.s32 2, %v25_v7  ;;  %v80_v13 = vsub.s32 6, %v25_v7  ;;  %p260_p0 = scmp.ne.s32.totalorder %s235_s2, %s259_s19  ;;  %p265_p2 = scmp.lt.s32.totalorder %s259_s19, %s259_s19 }
   0x7   :  { %45 = vperm.xlu0 %254, %v15_v0   ;;  %97 = vperm.xlu1 %256, %v15_v0   ;;  %v50_v14 = vsub.s32 1, %v25_v7  ;;  %v54_v15 = vsub.s32 5, %v25_v7  ;;  %v102_v16 = vsub.s32 3, %v25_v7  ;;  %v106_v17 = vsub.s32 7, %v25_v7 }
   0x8   :  { %v27_v18 = vrot.slane %v17_v10, %v26_v8  ;;  %v31_v19 = vrot.slane %v17_v10, %v30_v9  ;;  %v139_v20 = vrot.slane %v245_v11, %v26_v8  ;;  %v143_v21 = vrot.slane %v245_v11, %v30_v9  ;;  %p266_p3 = por %p265_p2, %p264_p1 }
   0x9   :  { %v77_v22 = vrot.slane %v17_v10, %v76_v12  ;;  %v81_v23 = vrot.slane %v17_v10, %v80_v13  ;;  %v181_v24 = vrot.slane %v245_v11, %v76_v12  ;;  %v185_v25 = vrot.slane %v245_v11, %v80_v13 }
   0xa   :  { %v51_v26 = vrot.slane %v17_v10, %v50_v14  ;;  %v55_v27 = vrot.slane %v17_v10, %v54_v15  ;;  %v159_v28 = vrot.slane %v245_v11, %v50_v14  ;;  %v163_v29 = vrot.slane %v245_v11, %v54_v15  ;;  %p267_p4 = pnand %p266_p3, %p260_p0 }
   0xb   :  { %257 = vset.pattern.permute.xlu1 %v281_v1  ;;  %258 = vset.pattern.permute.xlu0 %v281_v1  ;;  %v103_v30 = vrot.slane %v17_v10, %v102_v16  ;;  %v107_v31 = vrot.slane %v17_v10, %v106_v17  ;;  %v203_v32 = vrot.slane %v245_v11, %v102_v16 }
   0xc   :  { %124 = vperm.xlu1 %257, %v16_v5   ;;  %v207_v33 = vrot.slane %v245_v11, %v106_v17  ;;  %v37_v34 = vrot.slane %v27_v18, %v26_v8  ;;  %v41_v35 = vrot.slane %v31_v19, %v26_v8  ;;  %v149_v36 = vrot.slane %v139_v20, %v26_v8 }
   0xd   :  { %v153_v37 = vrot.slane %v143_v21, %v26_v8  ;;  %v87_v40 = vrot.slane %v77_v22, %v76_v12  ;;  %v91_v41 = vrot.slane %v81_v23, %v76_v12  ;;  %v191_v42 = vrot.slane %v181_v24, %v76_v12 }
   0xe   :  { %v195_v43 = vrot.slane %v185_v25, %v76_v12  ;;  %v61_v44 = vrot.slane %v51_v26, %v50_v14  ;;  %v65_v45 = vrot.slane %v55_v27, %v50_v14  ;;  %v169_v46 = vrot.slane %v159_v28, %v50_v14 }
   0xf   :  { %v173_v47 = vrot.slane %v163_v29, %v50_v14  ;;  %v113_v48 = vrot.slane %v103_v30, %v102_v16  ;;  %v117_v49 = vrot.slane %v107_v31, %v102_v16  ;;  %v213_v50 = vrot.slane %v203_v32, %v102_v16 }
  0x10   :  { %v217_v51 = vrot.slane %v207_v33, %v102_v16 }
  0x7d   :  { %v21_v38 = vpop.permute.xlu0 %20  ;;  %v72_v39 = vpop.permute.xlu1 %71 }
  0x7e   :  { %v42_v52 = vmul.f32 %v37_v34, %v21_v38  ;;  %v43_v53 = vmul.f32 %v41_v35, %v21_v38  ;;  %v154_v54 = vmul.f32 %v149_v36, %v21_v38  ;;  %v155_v55 = vmul.f32 %v153_v37, %v21_v38 }
  0x7f   :  { %v92_v56 = vmul.f32 %v87_v40, %v72_v39  ;;  %v93_v57 = vmul.f32 %v91_v41, %v72_v39  ;;  %v196_v58 = vmul.f32 %v191_v42, %v72_v39  ;;  %v197_v59 = vmul.f32 %v195_v43, %v72_v39 }
  0x82   :  { %v46_v60 = vpop.permute.xlu0 %45  ;;  %v98_v61 = vpop.permute.xlu1 %97 }
  0x83   :  { %v66_v62 = vmul.f32 %v61_v44, %v46_v60  ;;  %v67_v63 = vmul.f32 %v65_v45, %v46_v60  ;;  %v174_v0 = vmul.f32 %v169_v46, %v46_v60  ;;  %v175_v1 = vmul.f32 %v173_v47, %v46_v60 }
  0x84   :  { %v118_v2 = vmul.f32 %v113_v48, %v98_v61  ;;  %v119_v3 = vmul.f32 %v117_v49, %v98_v61  ;;  %v218_v4 = vmul.f32 %v213_v50, %v98_v61  ;;  %v219_v5 = vmul.f32 %v217_v51, %v98_v61 }
  0x85   :  { %v68_v6 = vadd.f32 %v66_v62, %v42_v52  ;;  %v69_v7 = vadd.f32 %v67_v63, %v43_v53  ;;  %v176_v8 = vadd.f32 %v174_v0, %v154_v54  ;;  %v177_v9 = vadd.f32 %v175_v1, %v155_v55 }
  0x87   :  { %v94_v10 = vadd.f32 %v92_v56, %v68_v6  ;;  %v95_v11 = vadd.f32 %v93_v57, %v69_v7  ;;  %v198_v12 = vadd.f32 %v196_v58, %v176_v8  ;;  %v199_v13 = vadd.f32 %v197_v59, %v177_v9  ;;  %v125_v14 = vpop.permute.xlu1 %124 }
  0x89   :  { %v120_v15 = vadd.f32 %v118_v2, %v94_v10  ;;  %v121_v16 = vadd.f32 %v119_v3, %v95_v11  ;;  %v220_v17 = vadd.f32 %v218_v4, %v198_v12  ;;  %v221_v18 = vadd.f32 %v219_v5, %v199_v13 }
  0x8b   :  { %v127_v19 = vadd.f32 %v125_v14, %v120_v15  ;;  %v128_v20 = vadd.f32 %v125_v14, %v121_v16  ;;  %v222_v21 = vadd.f32 %v220_v17, %v125_v14  ;;  %v223_v22 = vadd.f32 %v221_v18, %v125_v14 }
  0x8d   :  { %v129_v23 = vmax.f32 %v127_v19, 0.0  ;;  %v130_v24 = vmax.f32 %v128_v20, 0.0  ;;  %v224_v25 = vmax.f32 %v222_v21, 0.0  ;;  %v225_v26 = vmax.f32 %v223_v22, 0.0 }
  0x8f   :  { %131 = vst [vmem:[#allocation2] sm:$0xff] %v129_v23  ;;  %132 = vst [vmem:[#allocation2 + $0x8] sm:$0xff] %v130_v24 }
  0x90   :  { %227 = vst [vmem:[#allocation2 + $0x10] sm:$0xff] %v224_v25  ;;  %228 = vst [vmem:[#allocation2 + $0x18] sm:$0xff] %v225_v26 }
  0x91   :  { %270 = shalt.err (!%p267_p4)
}
  0x92   :  { %s286_s20 = smov 256   ;;  %s287_s21 = smov 16  }
  0x93   :  { %240 = dma.vmem_to_hbm [thread:$0]  %s235_s2, 512, %s326_s3, [#allocation3], %s286_s20, %s286_s20, %s287_s21  }
  0x94   :  { %279 = dma.done.wait [#allocation3], 512  }
  0x95   :  { %280 = vsyncadd [#allocation3], 4294966784 }
  0x96   :  { %244 = vsyncpa [#allocation3], 1 }

</bundles_post_ra>
